<compile_context>
chip_gen: v5e
topology: v5e:2x2
jax: 0.10.0
libtpu: 0.0.40
codegen_flags: <defaults>
</compile_context>

<pallas_src>
import jax
import jax.numpy as jnp
from jax.experimental import pallas as pl
from jax.experimental.pallas import tpu as pltpu


# ---------------- tiling helper ----------------

def _pick_l_tile(L, C, itemsize, cap_bytes=2 * 1024 * 1024):
    """Largest lane-dense L-tile such that a (C, tL) slab stays under cap_bytes.

    The tile must be a multiple of 128 (unmasked lane accesses) and divide L
    exactly; otherwise fall back to the full extent L (a block dim equal to the
    full array dim is always legal, even when not (8,128)-aligned)."""
    if L % 128 != 0 or C * L * itemsize <= cap_bytes:
        return L
    n128 = L // 128
    for k in range(n128, 0, -1):
        if n128 % k == 0 and C * k * 128 * itemsize <= cap_bytes:
            return k * 128
    return 128


# ---------------- wrapper + kernel ----------------

def cal_dist(x, *, block_cap_bytes=2 * 1024 * 1024):
    """Pallas TPU implementation of cal_dist.forward.

    x: (N, C, *spatial)  ->  (N, C)
    """
    N, C = x.shape[0], x.shape[1]
    L = 1
    for s in x.shape[2:]:
        L *= s
    x3 = x.reshape(N, C, L)

    tl = _pick_l_tile(L, C, x3.dtype.itemsize, block_cap_bytes)
    n_l = L // tl
    inv_l = 1.0 / float(L)

    def kernel(x_ref, o_ref, acc_ref):
        # x_ref: (1, C, tl)   o_ref: (1, C, 1)   acc_ref: (C, 1) f32 scratch
        li = pl.program_id(1)

        @pl.when(li == 0)
        def _():
            acc_ref[...] = jnp.zeros_like(acc_ref)

        xb = x_ref[0].astype(jnp.float32)                 # (C, tl)
        mean_c = jnp.mean(xb, axis=0, keepdims=True)      # (1, tl): mean over channels
        d = xb - mean_c                                   # (C, tl)
        acc_ref[...] += jnp.sum(d * d, axis=-1, keepdims=True)   # (C, 1) partial SSQ

        @pl.when(li == n_l - 1)
        def _():
            o_ref[0] = (acc_ref[...] * inv_l).astype(o_ref.dtype)

    out3 = pl.pallas_call(
        kernel,
        out_shape=jax.ShapeDtypeStruct((N, C, 1), x.dtype),
        grid_spec=pltpu.PrefetchScalarGridSpec(
            num_scalar_prefetch=0,
            grid=(N, n_l),                                # reduction axis (L) last
            in_specs=[
                pl.BlockSpec((1, C, tl), lambda n, l: (n, 0, l)),
            ],
            out_specs=pl.BlockSpec((1, C, 1), lambda n, l: (n, 0, 0)),
            scratch_shapes=[pltpu.VMEM((C, 1), jnp.float32)],
        ),
        compiler_params=pltpu.CompilerParams(
            dimension_semantics=("parallel", "arbitrary")),
    )(x3)
    return out3.reshape(N, C)


# ---------------- pure-JAX reference ----------------

def cal_dist_ref(x):
    N, C = x.shape[0], x.shape[1]
    out = x.reshape(N, C, -1)
    mean = jnp.mean(out, axis=1, keepdims=True)
    return jnp.mean((out - mean) ** 2, axis=-1)


# ---------------- demo / check ----------------

if __name__ == "__main__":
    key = jax.random.PRNGKey(0)
    k1, k2 = jax.random.split(key)

    # conv-feature-map style input (N, C, H, W), as the module expects
    N, C, H, W = 2, 4, 16, 16
    x = jax.random.normal(k1, (N, C, H, W), dtype=jnp.float32)

    out = cal_dist(x)
    jax.block_until_ready(out)
    ref = cal_dist_ref(x)
    assert out.shape == (N, C)
    assert jnp.allclose(out, ref, atol=1e-5, rtol=1e-5), "cal_dist mismatch (L=256)"

    # small-spatial case (deep VGG layers: H*W < 128 -> full-extent lane block)
    x2 = jax.random.normal(k2, (2, 8, 4, 4), dtype=jnp.float32)
    out2 = cal_dist(x2)
    jax.block_until_ready(out2)
    ref2 = cal_dist_ref(x2)
    assert out2.shape == (2, 8)
    assert jnp.allclose(out2, ref2, atol=1e-5, rtol=1e-5), "cal_dist mismatch (L=16)"

    print("KERNEL_OK")
</pallas_src>

<mosaic_0001>
module attributes {stable_mosaic.version = 11 : i64} {
  func.func @kernel(%arg0: i32, %arg1: i32, %arg2: memref<1x4x256xf32, #tpu.memory_space<vmem>>, %arg3: memref<1x4x1xf32, #tpu.memory_space<vmem>>, %arg4: memref<4x1xf32, #tpu.memory_space<vmem>>) attributes {dimension_semantics = [#tpu.dimension_semantics<parallel>, #tpu.dimension_semantics<arbitrary>], iteration_bounds = array<i64: 2, 1>, scalar_prefetch = 0 : i64, scratch_operands = 1 : i64, tpu.core_type = #tpu.core_type<tc>, window_params = [{transform_indices = @transform_0, window_bounds = array<i64: 1, 4, 256>}, {transform_indices = @transform_1, window_bounds = array<i64: 1, 4, 1>}]} {
    %c0_i32 = arith.constant 0 : i32
    %0 = arith.cmpi eq, %arg1, %c0_i32 : i32
    %1 = arith.extui %0 : i1 to i32
    %c0_i32_0 = arith.constant 0 : i32
    %2 = arith.cmpi ne, %1, %c0_i32_0 : i32
    scf.if %2 {
      %cst_11 = arith.constant 0.000000e+00 : f32
      %20 = vector.broadcast %cst_11 : f32 to vector<4x1xf32>
      %c0_12 = arith.constant 0 : index
      %c0_13 = arith.constant 0 : index
      %21 = vector.load %arg4[%c0_12, %c0_13] : memref<4x1xf32, #tpu.memory_space<vmem>>, vector<4x1xf32>
      tpu.vector_store %arg4[%c0_12, %c0_13], %20 {strides = array<i32>} : memref<4x1xf32, #tpu.memory_space<vmem>>, vector<4x1xf32>,
    } else {
    }
    %c0 = arith.constant 0 : index
    %c0_1 = arith.constant 0 : index
    %c0_2 = arith.constant 0 : index
    %3 = vector.load %arg2[%c0, %c0_1, %c0_2] : memref<1x4x256xf32, #tpu.memory_space<vmem>>, vector<1x4x256xf32>
    %4 = vector.shape_cast %3 : vector<1x4x256xf32> to vector<4x256xf32>
    %cst = arith.constant dense<0.000000e+00> : vector<256xf32>
    %5 = vector.multi_reduction <add>, %4, %cst [0] : vector<4x256xf32> to vector<256xf32>
    %6 = vector.shape_cast %5 : vector<256xf32> to vector<1x256xf32>
    %cst_3 = arith.constant 4.000000e+00 : f32
    %7 = vector.broadcast %cst_3 : f32 to vector<1x256xf32>
    %8 = arith.divf %6, %7 : vector<1x256xf32>
    %9 = vector.broadcast %8 : vector<1x256xf32> to vector<4x256xf32>
    %10 = arith.subf %4, %9 : vector<4x256xf32>
    %c0_4 = arith.constant 0 : index
    %c0_5 = arith.constant 0 : index
    %11 = vector.load %arg4[%c0_4, %c0_5] : memref<4x1xf32, #tpu.memory_space<vmem>>, vector<4x1xf32>
    %12 = arith.mulf %10, %10 : vector<4x256xf32>
    %cst_6 = arith.constant dense<0.000000e+00> : vector<4xf32>
    %13 = vector.multi_reduction <add>, %12, %cst_6 [1] : vector<4x256xf32> to vector<4xf32>
    %14 = vector.shape_cast %13 : vector<4xf32> to vector<4x1xf32>
    %15 = arith.addf %11, %14 : vector<4x1xf32>
    %c0_7 = arith.constant 0 : index
    %c0_8 = arith.constant 0 : index
    %16 = vector.load %arg4[%c0_7, %c0_8] : memref<4x1xf32, #tpu.memory_space<vmem>>, vector<4x1xf32>
    tpu.vector_store %arg4[%c0_7, %c0_8], %15 {strides = array<i32>} : memref<4x1xf32, #tpu.memory_space<vmem>>, vector<4x1xf32>,
    %c0_i32_9 = arith.constant 0 : i32
    %17 = arith.cmpi eq, %arg1, %c0_i32_9 : i32
    %18 = arith.extui %17 : i1 to i32
    %c0_i32_10 = arith.constant 0 : i32
    %19 = arith.cmpi ne, %18, %c0_i32_10 : i32
    scf.if %19 {
      %c0_11 = arith.constant 0 : index
      %c0_12 = arith.constant 0 : index
      %20 = vector.load %arg4[%c0_11, %c0_12] : memref<4x1xf32, #tpu.memory_space<vmem>>, vector<4x1xf32>
      %cst_13 = arith.constant 3.906250e-03 : f32
      %21 = vector.broadcast %cst_13 : f32 to vector<4x1xf32>
      %22 = arith.mulf %20, %21 : vector<4x1xf32>
      %c0_14 = arith.constant 0 : index
      %c0_15 = arith.constant 0 : index
      %c0_16 = arith.constant 0 : index
      %23 = vector.load %arg3[%c0_14, %c0_15, %c0_16] : memref<1x4x1xf32, #tpu.memory_space<vmem>>, vector<1x4x1xf32>
      %24 = vector.shape_cast %23 : vector<1x4x1xf32> to vector<4x1xf32>
      %25 = vector.shape_cast %22 : vector<4x1xf32> to vector<1x4x1xf32>
      tpu.vector_store %arg3[%c0_14, %c0_15, %c0_16], %25 {strides = array<i32>} : memref<1x4x1xf32, #tpu.memory_space<vmem>>, vector<1x4x1xf32>,
    } else {
    }
    return
  }
  func.func @transform_0(%arg0: i32, %arg1: i32) -> (i32, i32, i32) {
    %c0_i32 = arith.constant 0 : i32
    %c0_i32_0 = arith.constant 0 : i32
    return %arg0, %c0_i32, %arg1 : i32, i32, i32
  }
  func.func @transform_1(%arg0: i32, %arg1: i32) -> (i32, i32, i32) {
    %c0_i32 = arith.constant 0 : i32
    %c0_i32_0 = arith.constant 0 : i32
    %c0_i32_1 = arith.constant 0 : i32
    return %arg0, %c0_i32, %c0_i32_0 : i32, i32, i32
  }
}

</mosaic_0001>

<bundles_post_ra>
// kernel: tpu_custom_call.1
= control target key start
LH: loop header
LB: loop body
LE: loop exit
PB: predicated region body
PF: predicated region fallthrough
CT: control target
= control target key end

     0   :  { %6 = vsyncpa [#allocation4], 0  ;;  %s555_s0 = inlined_call_operand.hbm [shape: f32[2,4,256], index: 0, kind: input, shape index: {}]   ;;  %s556_s1 = inlined_call_operand.vmem [shape: f32[2,4,1], index: 1, kind: output, shape index: {}]  }
   0x1   :  { %8 = vsyncpa [#allocation4 + $0x1], 0  ;;  %s459_s6 = smov 0   ;;  %s461_s7 = smov 0  }
   0x2   :  { %s463_s8 = smov 0   ;;  %s465_s9 = smov 0  }
   0x3   :  { %s467_s10 = smov 0   ;;  %s469_s11 = smov 0  }
   0x4 LB: > { %s293_s12 = sadd.s32 4294967295, %s445_s11   ;;  %s26_s13 = sadd.s32 1, %s441_s10  ;;  %s445_s11 = sphi %s469_s11, %s14_s11   ;;  %s441_s10 = sphi %s467_s10, %s563_s10   ;;  %s437_s9 = sphi %s465_s9, %s562_s9   ;;  %s433_s8 = sphi %s463_s8, %s561_s8   ;;  %s429_s7 = sphi %s461_s7, %s560_s7   ;;  %s425_s6 = sphi %s459_s6, %s559_s6  }
   0x5   : > { %p28_p0 = scmp.ge.s32.totalorder %s26_s13, 2  ;;  %s35_s14 = sadd.s32 1, %s433_s8 }
   0x6   : > { %p42_p1 = scmp.ne.s32.totalorder %s433_s8, %s429_s7  ;;  %p43_p2 = scmp.eq.s32.totalorder %s445_s11, 0 }
   0x7   : > { %s565_s13 = smov (%p28_p0, %s26_s13), 0  ;;  %p48_p4 = scmp.ne.s32.totalorder %s429_s7, %s425_s6 }
   0x8   : > { %p495_p3 = por %p43_p2, %p42_p1  ;;  %s30_s16 = ssub.s32 %s441_s10, %s565_s13 }
   0x9   : > { %p49_p5 = scmp.eq.s32.totalorder %s293_s12, 0  ;;  %p33_p6 = scmp.eq.s32.totalorder %s30_s16, 0 }
   0xa   : > { %p312_p8 = scmp.lt.s32.totalorder %s445_s11, 2  ;;  %s98_s19 = sand.u32 1, %s433_s8  }
   0xb   : > { %p502_p7 = por %p49_p5, %p48_p4  ;;  %s305_s20 = sshll.u32 %s441_s10, 3 }
   0xc   : > { %s508_s18 = scalar_select %p33_p6, %s433_s8, %s35_s14  }
   0xd   : > { %s297_s21 = sshll.u32 %s98_s19, 3  ;;  %s109_s24 = scalar_lea.hbm %s555_s0, %s305_s20 }
   0xe   : > { %s111_s25 = sshll.u32 %s109_s24, 4  ;;  %s102_s26 = scalar_lea.vmem [#allocation3], %s297_s21  ;;  %s112_s25 = int_to_ptr.hbm [resolvable:$true] %s111_s25 }
   0xf   : > { %s113_s27 = sshll.u32 %s102_s26, 4  ;;  %p309_p9 = pnand %p312_p8, %p495_p3  ;;  %s114_s27 = int_to_ptr.vmem [resolvable:$true] %s113_s27 }
  0x10   : > { %p300_p10 = scmp.ge.s32.totalorder %s445_s11, 1  ;;  %p118_p11 = scmp.lt.s32.totalorder %s445_s11, 3 }
  0x11   : > { %s99_s28 = scalar_lea.sflag [#allocation4], %s98_s19 }
  0x12   : > { %311 = dma.hbm_to_vmem [thread:$0]  (!%p309_p9), %s112_s25, 128, %s114_s27, %s99_s28  }
  0x13   : > { %p119_p12 = pnand %p300_p10, %p118_p11 }
  0x14   : > { %s124_s29 = sand.u32 (!%p119_p12), 1, %s429_s7  }
  0x15   : > { %122 = sbr.rel (%p119_p12) target bundleno = 199 (0xc7), region = 24  ;;  %s301_s30 = sshll.u32 (!%p119_p12), %s124_s29, 3 }
  0x16   : > { %s125_s2 = scalar_lea.sflag (!%p119_p12), [#allocation4], %s124_s29  ;;  %s128_s3 = scalar_lea.vmem (!%p119_p12), [#allocation3], %s301_s30 }
  0x1a   : > { %420 = dma.done.wait (%p502_p7), %s125_s2, 128  }
  0x1b   : > { %422 = vsyncadd (%p502_p7), %s125_s2, 4294967168  ;;  %v447_v0 = vmov 4.0   ;;  %v158_v2 = vld [vmem:[%s128_s3] sm:$0xff]  ;;  %vm165_vm0 = vcmask 1043456   ;;  %vm156_vm1 = vcmask 3072   ;;  %v448_v12 = vmov 0.0  }
  0x1c   : > { %363 = vrcp.f32 %v447_v0  ;;  %160 = vst [vmem:[#allocation1] ss:$2 sm:$0xff] %v158_v2  ;;  %p148_p13 = scmp.lt.s32.totalorder %s437_s9, 1 }
  0x1d   : > { %157 = vst.msk [vmem:[#allocation2] sm:$0xf] %vm156_vm1, %v448_v12 }
  0x1e   : > { %s567_s9 = smov (!%p148_p13, %s437_s9), 1 }
  0x1f   : > { %s302_s4 = sshll.u32 %s567_s9, 2 }
  0x20   : > { %s151_s12 = scalar_lea.vmem %s556_s1, %s302_s4 }
  0x22   : > { %v364_v1 = vpop.eup %363 }
  0x23   : > { %v181_v3 = vmul.f32 4.0, %v364_v1  ;;  %v161_v5 = vld.sshfl [vmem:[#allocation1] sm:$0xff pattern:$0x75316420]  ;;  %vm185_vm2 = vweird.f32 %v364_v1 }
  0x24   : > { %v162_v6 = vld.sshfl [vmem:[#allocation1 + $0x8] sm:$0xff pattern:$0x75316420]  ;;  %v166_v7 = vsel %vm165_vm0, %v161_v5, 0.0 }
  0x25   : > { %v182_v4 = vsub.f32 1.0, %v181_v3  ;;  %v173_v8 = vsel %vm165_vm0, %v162_v6, 0.0  ;;  %v167_v9 = vrot.slane %v166_v7, 4  ;;  %v195_v36 = vld [vmem:[#allocation2] sm:$0xf] }
  0x26   : > { %v174_v10 = vrot.slane %v173_v8, 4 }
  0x27   : > { %v183_v11 = vmul.f32 %v364_v1, %v182_v4  ;;  %v168_v13 = vadd.f32 %v167_v9, %v166_v7 }
  0x28   : > { %v175_v14 = vadd.f32 %v174_v10, %v173_v8 }
  0x29   : > { %v169_v15 = vrot.slane %v168_v13, 2  ;;  %v184_v17 = vadd.f32 %v364_v1, %v183_v11 }
  0x2a   : > { %v176_v16 = vrot.slane %v175_v14, 2 }
  0x2b   : > { %v170_v18 = vadd.f32 %v169_v15, %v168_v13  ;;  %v186_v22 = vsel %vm185_vm2, %v364_v1, %v184_v17 }
  0x2c   : > { %v177_v19 = vadd.f32 %v176_v16, %v175_v14 }
  0x2d   : > { %v171_v20 = vrot.slane %v170_v18, 1 }
  0x2e   : > { %v178_v21 = vrot.slane %v177_v19, 1 }
  0x2f   : > { %v172_v23 = vadd.f32 %v171_v20, %v170_v18 }
  0x30   : > { %v179_v24 = vadd.f32 %v178_v21, %v177_v19 }
  0x31   : > { %v187_v25 = vmul.f32 %v186_v22, %v172_v23 }
  0x32   : > { %v188_v26 = vmul.f32 %v186_v22, %v179_v24 }
  0x34   : > { %v191_v27 = vrot.slane %v188_v26, 4 }
  0x36   : > { %v192_v28 = vsel %vm165_vm0, %v187_v25, %v191_v27 }
  0x37   : > { %v194_v29 = vsub.f32 %v158_v2, %v192_v28 }
  0x39   : > { %v196_v30 = vmul.f32 %v194_v29, %v194_v29 }
  0x3b   : > { %198 = vst [vmem:[#allocation1] ss:$2 sm:$0xff] %v196_v30 }
  0x42   : > { %v199_v31 = vld.sshfl [vmem:[#allocation1] sm:$0xff pattern:$0x75316420]  ;;  %v200_v32 = vld.sshfl [vmem:[#allocation1 + $0x8] sm:$0xff pattern:$0x75316420] }
  0x43   : > { %v203_v33 = vsel %vm165_vm0, %v199_v31, 0.0  ;;  %v204_v34 = vsel %vm165_vm0, %v200_v32, 0.0 }
  0x44   : > { %v205_v35 = vadd.f32 %v204_v34, %v203_v33 }
  0x46   : > { %206 = vadd.xlane.f32.xlu0 %v205_v35 }
  0xb9   : > { %v207_v37 = vpop.xlane.xlu0 %206 }
  0xba   : > { %v208_v38 = vadd.f32 %v207_v37, %v195_v36 }
  0xbc   : > { %210 = vst.msk [vmem:[#allocation2] sm:$0xf] %vm156_vm1, %v208_v38 }
  0xc3   : > { %v214_v39 = vld [vmem:[#allocation2] sm:$0xf] }
  0xc4   : > { %v215_v40 = vmul.f32 0.00390625, %v214_v39 }
  0xc6   : > { %216 = vst.msk [vmem:[%s151_s12] sm:$0xf] %vm156_vm1, %v215_v40 }
  0xc7 PF: > { %s14_s11 = sadd.s32 1, %s445_s11   ;;  %s559_s6 = smov %s429_s7 }
  0xc8   : > { %p11_p0 = scmp.ge.s32.totalorder %s14_s11, 4   ;;  %s560_s7 = smov %s433_s8 }
  0xc9   : > { %s561_s8 = smov %s508_s18  ;;  %s562_s9 = smov %s441_s10 }
  0xca   : > { %s563_s10 = smov %s565_s13  ;;  %13 = sbr.rel (!%p11_p0) target bundleno = 4 (0x4), region = 72 }
  0xcf   :  { %236 = vsyncpa [#allocation4], 1 }
  0xd0   :  { %238 = vsyncpa [#allocation4 + $0x1], 1 }

</bundles_post_ra>
